<compile_context>
chip_gen: v7x
topology: tpu7x:2x2x1
jax: 0.10.0
libtpu: 0.0.40
codegen_flags: <defaults>
</compile_context>

<pallas_src>
import math

import jax
import jax.numpy as jnp
from jax.experimental import pallas as pl
from jax.experimental.pallas import tpu as pltpu

_LANES = 128


def _round_up(x, m):
    return (x + m - 1) // m * m


def _row_tiling(rows, max_rows):
    """Pick (row_tile, num_steps) for a 1-D grid over `rows` rows.

    * row_tile is a multiple of 8 (sublane granularity) unless rows <= 8, in which
      case it is the full extent.
    * num_steps is preferably even (>= 2) so the "parallel" grid axis splits evenly
      across the two v7x TensorCores.
    * rows does NOT need to be a multiple of row_tile: Pallas clips the last block's
      DMAs, so no padding / slicing is needed in the wrapper.
    """
    if rows <= 8:
        return rows, 1
    nsteps = max(2, pl.cdiv(rows, max_rows))
    nsteps = _round_up(nsteps, 2)                       # even -> 2-TC balance on v7x
    rt = _round_up(pl.cdiv(rows, nsteps), 8)
    nsteps = pl.cdiv(rows, rt)
    return rt, nsteps


def _bessel_kernel_packed(x_ref, sel_f_ref, f_ref, o_ref):
    # x_ref    : (rt, L)    distances (L = 128 // n_rbf)
    # sel_f_ref: (L, 128)   sel_f[l, j] = freqs[j % n_rbf] if j // n_rbf == l else 0
    # f_ref    : (1, 128)   f[0, j]     = freqs[j % n_rbf]
    # o_ref    : (rt, 128)  lane-dense view of the (rt*L, n_rbf) output slab
    #
    # Single MXU matmul produces ax[r, j] = x[r, j // n_rbf] * freqs[j % n_rbf];
    # then sin(f*x)/x == f * sin(ax)/ax, with the x == 0 (coulomb decay) case handled
    # by the ax == 0 guard (sin(0) * 1 = 0, matching the reference).
    ax = jnp.dot(x_ref[...], sel_f_ref[...],
                 precision=jax.lax.Precision.HIGHEST,
                 preferred_element_type=jnp.float32)          # (rt, 128)
    safe = jnp.where(ax == 0.0, 1.0, ax)
    # TODO(synk): if jnp.sin lowers to a VALU polynomial it becomes the binding slot on
    # v6e/v7x; a sin(k*theta) Chebyshev recurrence (1 sin + 1 cos per distance) would
    # cut transcendental work further.
    o_ref[...] = f_ref[...] * jnp.sin(ax) * pl.reciprocal(safe, approx=False)


def _bessel_kernel_simple(x_ref, f_ref, o_ref):
    # Fallback path (n_rbf does not divide 128, or n_rbf >= 128).
    # x_ref: (rt, 1), f_ref: (1, n_rbf), o_ref: (rt, n_rbf)
    x = x_ref[...]
    ax = x * f_ref[...]
    norm = jnp.where(x == 0.0, 1.0, x)
    o_ref[...] = jnp.sin(ax) * pl.reciprocal(norm, approx=False)


def bessel_basis(inputs, freqs, *, max_block_rows: int = 4096):
    """Pallas implementation of BesselBasis.forward.

    inputs: float array of any shape (...,)
    freqs : float array of shape (n_rbf,)
    returns: float32 array of shape (..., n_rbf)
    """
    n_rbf = int(freqs.shape[0])
    orig_shape = inputs.shape
    x = inputs.reshape(-1).astype(jnp.float32)
    n = int(x.shape[0])
    freqs = freqs.astype(jnp.float32)

    if n == 0:
        return jnp.zeros((*orig_shape, n_rbf), jnp.float32)

    cparams = pltpu.CompilerParams(
        dimension_semantics=("parallel",),
        vmem_limit_bytes=32 * 1024 * 1024,
    )

    if 0 < n_rbf < _LANES and _LANES % n_rbf == 0:
        # ---- lane-dense packed path: output viewed as (rows, 128) ----
        L = _LANES // n_rbf
        if n % L == 0:
            rows = n // L                       # exact: no input pad, no output slice
            xp = x
        else:
            rows = pl.cdiv(n, L)
            # TODO(synk): ragged tail costs one pad + one slice HBM pass; keep the flat
            # input length a multiple of 128 // n_rbf upstream to avoid both.
            xp = jnp.pad(x, (0, rows * L - n))  # padded elems: f*sin(0)*1 = 0, dropped below
        x2 = xp.reshape(rows, L)

        lane = jnp.arange(_LANES, dtype=jnp.int32)
        row = jnp.arange(L, dtype=jnp.int32)
        f_wide = jnp.tile(freqs, L).reshape(1, _LANES)        # f_wide[0, j] = freqs[j % n_rbf]
        sel_f = jnp.where(lane[None, :] // n_rbf == row[:, None], f_wide, 0.0)  # (L, 128)

        rt, nsteps = _row_tiling(rows, max_block_rows)

        out = pl.pallas_call(
            _bessel_kernel_packed,
            out_shape=jax.ShapeDtypeStruct((rows, _LANES), jnp.float32),
            grid=(nsteps,),
            in_specs=[
                pl.BlockSpec((rt, L), lambda i: (i, 0)),
                pl.BlockSpec((L, _LANES), lambda i: (0, 0)),   # resident in VMEM
                pl.BlockSpec((1, _LANES), lambda i: (0, 0)),   # resident in VMEM
            ],
            out_specs=pl.BlockSpec((rt, _LANES), lambda i: (i, 0)),
            compiler_params=cparams,
        )(x2, sel_f, f_wide)

        out = out.reshape(rows * L, n_rbf)      # free, row-major contiguous view
        if rows * L != n:
            out = out[:n]
    else:
        # ---- general fallback, exact-size output (no pad / no slice) ----
        # TODO(synk): last dim < 128 means masked vst partial stores; a generalized
        # lane-dense repack (cycling lcm(n_rbf,128)/128 selector rows) would recover
        # the ~4x lane-density win for n_rbf values that don't divide 128.
        width_pad = _round_up(max(n_rbf, 1), _LANES)
        budget_rows = max(8, (4 * 1024 * 1024) // (4 * width_pad))
        rt, nsteps = _row_tiling(n, min(max_block_rows, budget_rows))
        x2 = x.reshape(n, 1)
        f2 = freqs.reshape(1, n_rbf)

        out = pl.pallas_call(
            _bessel_kernel_simple,
            out_shape=jax.ShapeDtypeStruct((n, n_rbf), jnp.float32),
            grid=(nsteps,),
            in_specs=[
                pl.BlockSpec((rt, 1), lambda i: (i, 0)),
                pl.BlockSpec((1, n_rbf), lambda i: (0, 0)),
            ],
            out_specs=pl.BlockSpec((rt, n_rbf), lambda i: (i, 0)),
            compiler_params=cparams,
        )(x2, f2)

    # TODO(synk): a bf16 output store would halve HBM write traffic (big win on v5e)
    # if downstream consumers tolerate it; kept f32 to match module semantics.
    return out.reshape(*orig_shape, n_rbf)


def make_bessel_params(cutoff: float, n_rbf: int):
    """Deterministic buffer init, mirrors BesselBasis.__init__."""
    return jnp.arange(1, n_rbf + 1, dtype=jnp.float32) * (math.pi / cutoff)


def _reference(inputs, freqs):
    # pure-JAX reference mirroring the PyTorch forward exactly
    a = freqs[None, :]
    x = inputs[..., None]
    ax = x * a
    sinax = jnp.sin(ax)
    norm = jnp.where(x == 0.0, jnp.float32(1.0), x)
    return sinax / norm


if __name__ == "__main__":
    cutoff = 5.0
    n_rbf = 16
    n_edges = 128  # e.g. number of pairwise distances

    key = jax.random.PRNGKey(0)
    k0, k1, k2 = jax.random.split(key, 3)

    # distances in [0, cutoff); include an exact zero to exercise the norm branch
    d = jax.random.uniform(k0, (n_edges,), dtype=jnp.float32, maxval=cutoff)
    d = d.at[0].set(0.0)
    freqs = make_bessel_params(cutoff, n_rbf)

    y = jax.block_until_ready(bessel_basis(d, freqs))
    y_ref = _reference(d, freqs)
    assert y.shape == (n_edges, n_rbf)
    assert jnp.allclose(y, y_ref, atol=1e-5, rtol=1e-5), float(jnp.max(jnp.abs(y - y_ref)))

    # ragged length (exercises the pad + slice tail path of the packed kernel)
    d2 = jax.random.uniform(k1, (101,), dtype=jnp.float32, maxval=cutoff)
    y2 = jax.block_until_ready(bessel_basis(d2, freqs))
    assert y2.shape == (101, n_rbf)
    assert jnp.allclose(y2, _reference(d2, freqs), atol=1e-5, rtol=1e-5)

    # fallback path (n_rbf does not divide 128)
    freqs3 = make_bessel_params(cutoff, 20)
    d3 = jax.random.uniform(k2, (40,), dtype=jnp.float32, maxval=cutoff)
    y3 = jax.block_until_ready(bessel_basis(d3, freqs3))
    assert y3.shape == (40, 20)
    assert jnp.allclose(y3, _reference(d3, freqs3), atol=1e-5, rtol=1e-5)

    print("KERNEL_OK")
</pallas_src>

<mosaic_0001>
module attributes {stable_mosaic.version = 11 : i64} {
  func.func @_bessel_kernel_packed(%arg0: i32, %arg1: memref<8x8xf32, #tpu.memory_space<vmem>>, %arg2: memref<8x128xf32, #tpu.memory_space<vmem>>, %arg3: memref<1x128xf32, #tpu.memory_space<vmem>>, %arg4: memref<8x128xf32, #tpu.memory_space<vmem>>) attributes {dimension_semantics = [#tpu.dimension_semantics<parallel>], iteration_bounds = array<i64: 2>, scalar_prefetch = 0 : i64, scratch_operands = 0 : i64, tpu.core_type = #tpu.core_type<tc>, window_params = [{transform_indices = @transform_0, window_bounds = array<i64: 8, 8>}, {pipeline_mode = #tpu.pipeline_mode<synchronous>, transform_indices = @transform_1, window_bounds = array<i64: 8, 128>}, {pipeline_mode = #tpu.pipeline_mode<synchronous>, transform_indices = @transform_2, window_bounds = array<i64: 1, 128>}, {transform_indices = @transform_3, window_bounds = array<i64: 8, 128>}]} {
    %c0 = arith.constant 0 : index
    %c0_0 = arith.constant 0 : index
    %0 = vector.load %arg1[%c0, %c0_0] : memref<8x8xf32, #tpu.memory_space<vmem>>, vector<8x8xf32>
    %c0_1 = arith.constant 0 : index
    %c0_2 = arith.constant 0 : index
    %1 = vector.load %arg2[%c0_1, %c0_2] : memref<8x128xf32, #tpu.memory_space<vmem>>, vector<8x128xf32>
    %cst = arith.constant dense<0.000000e+00> : vector<8x128xf32>
    %2 = tpu.matmul %0, %1, %cst {dimension_numbers = #tpu.dot_dimension_numbers<[1], [0], [0], [1], [0, 0, 1, 1], [], []>, precision = #tpu.contract_precision<fp32>} : vector<8x8xf32>, vector<8x128xf32>, vector<8x128xf32> -> vector<8x128xf32>
    %cst_3 = arith.constant 0.000000e+00 : f32
    %3 = vector.broadcast %cst_3 : f32 to vector<8x128xf32>
    %4 = arith.cmpf oeq, %2, %3 : vector<8x128xf32>
    %cst_4 = arith.constant 1.000000e+00 : f32
    %5 = vector.broadcast %cst_4 : f32 to vector<8x128xf32>
    %6 = arith.select %4, %5, %2 : vector<8x128xi1>, vector<8x128xf32>
    %c0_5 = arith.constant 0 : index
    %c0_6 = arith.constant 0 : index
    %7 = vector.load %arg3[%c0_5, %c0_6] : memref<1x128xf32, #tpu.memory_space<vmem>>, vector<1x128xf32>
    %8 = math.sin %2 : vector<8x128xf32>
    %9 = vector.broadcast %7 : vector<1x128xf32> to vector<8x128xf32>
    %10 = arith.mulf %9, %8 : vector<8x128xf32>
    %11 = tpu.reciprocal %6 : vector<8x128xf32> -> vector<8x128xf32>
    %12 = arith.mulf %10, %11 : vector<8x128xf32>
    %c0_7 = arith.constant 0 : index
    %c0_8 = arith.constant 0 : index
    %13 = vector.load %arg4[%c0_7, %c0_8] : memref<8x128xf32, #tpu.memory_space<vmem>>, vector<8x128xf32>
    tpu.vector_store %arg4[%c0_7, %c0_8], %12 {strides = array<i32>} : memref<8x128xf32, #tpu.memory_space<vmem>>, vector<8x128xf32>,
    return
  }
  func.func @transform_0(%arg0: i32) -> (i32, i32) {
    %c0_i32 = arith.constant 0 : i32
    %c0_i32_0 = arith.constant 0 : i32
    return %arg0, %c0_i32 : i32, i32
  }
  func.func @transform_1(%arg0: i32) -> (i32, i32) {
    %c0_i32 = arith.constant 0 : i32
    %c0_i32_0 = arith.constant 0 : i32
    %c0_i32_1 = arith.constant 0 : i32
    return %c0_i32, %c0_i32_0 : i32, i32
  }
  func.func @transform_2(%arg0: i32) -> (i32, i32) {
    %c0_i32 = arith.constant 0 : i32
    %c0_i32_0 = arith.constant 0 : i32
    %c0_i32_1 = arith.constant 0 : i32
    return %c0_i32, %c0_i32_0 : i32, i32
  }
  func.func @transform_3(%arg0: i32) -> (i32, i32) {
    %c0_i32 = arith.constant 0 : i32
    %c0_i32_0 = arith.constant 0 : i32
    return %arg0, %c0_i32 : i32, i32
  }
}

</mosaic_0001>

<bundles_post_ra>
// kernel: tpu_custom_call.1
= control target key start
LH: loop header
LB: loop body
LE: loop exit
PB: predicated region body
PF: predicated region fallthrough
CT: control target
= control target key end

     0   :  { %8 = vsyncpa [#allocation3], 0  ;;  %s1159_s0 = inlined_call_operand.vmem [shape: f32[16,8], index: 0, kind: input, shape index: {}]   ;;  %s1160_s1 = inlined_call_operand.vmem [shape: f32[8,128], index: 1, kind: input, shape index: {}]   ;;  %s1161_s2 = inlined_call_operand.vmem [shape: f32[1,128], index: 2, kind: input, shape index: {}]   ;;  %s1162_s3 = inlined_call_operand.hbm [shape: f32[16,128], index: 3, kind: output, shape index: {}]  }
   0x1   :  { %10 = vsyncpa [#allocation3 + $0x1], 0  ;;  %s1024_s12 = smov 0   ;;  %s1026_s13 = smov 0  }
   0x2   :  { %s1028_s14 = smov 0   ;;  %s1030_s15 = smov 0  }
   0x3 LB: > { %s1045_s16 = sadd.s32 4294967295, %s993_s15   ;;  %s808_s17 = sadd.s32 4294967294, %s993_s15   ;;  %s993_s15 = sphi %s1030_s15, %s1168_s15   ;;  %s989_s14 = sphi %s1028_s14, %s1167_s14   ;;  %s985_s13 = sphi %s1026_s13, %s1166_s13   ;;  %s981_s12 = sphi %s1024_s12, %s1165_s12  }
   0x4   : > { %s1049_s18 = sadd.s32 1, %s993_s15   ;;  %s91_s19 = sadd.s32 1, %s989_s14 }
   0x5   : > { %s88_s20 = ssub.s32 %s993_s15, %s1049_s18  ;;  %p101_p0 = scmp.ne.s32.totalorder %s989_s14, %s985_s13 }
   0x6   : > { %p89_p1 = scmp.eq.s32.totalorder %s88_s20, 0  ;;  %p102_p2 = scmp.eq.s32.totalorder %s1045_s16, 1 }
   0x7   : > { %p107_p3 = scmp.ne.s32.totalorder %s985_s13, %s981_s12  ;;  %p108_p4 = scmp.eq.s32.totalorder %s808_s17, 1 }
   0x8   : > { %s1060_s21 = scalar_select %p89_p1, %s989_s14, %s91_s19  }
   0x9   : > { %p1062_p5 = por %p102_p2, %p101_p0  ;;  %p1066_p6 = por %p108_p4, %p107_p3 }
   0xa   : > { %p811_p7 = scmp.ge.s32.totalorder %s993_s15, 1  ;;  %p139_p8 = scmp.lt.s32.totalorder %s993_s15, 3 }
   0xc   : > { %p140_p9 = pnand %p811_p7, %p139_p8 }
   0xd   : > { %v167_v0 = vld [vmem:[%s1160_s1] sm:$0xff] (!%p140_p9)  ;;  %p162_p10 = scmp.lt.s32.totalorder (!%p140_p9), %s1045_s16, 1  ;;  %v995_v1 = vmov (!%p140_p9), 0.0   ;;  %vm996_vm0 = vmmov (!%p140_p9), 0   ;;  %vm168_vm1 = vcmask (!%p140_p9), 64512   ;;  %s159_s4 = sand.u32 (!%p140_p9), 1, %s985_s13  }
   0xe   : > { %143 = sbr.rel (%p140_p9) target bundleno = 364 (0x16c), region = 32  ;;  %850 = vmatprep.subr.mxu0 (!%p140_p9), %v995_v1  ;;  %v173_v2 = vand.u32 (!%p140_p9), 4294901760, %v167_v0  ;;  %852 = vmatprep.mubr.msk.f32.mxu0 (!%p140_p9), %vm996_vm0, %v995_v1  ;;  %v997_v29 = vmov (!%p140_p9), 683565275   ;;  %v998_v31 = vmov (!%p140_p9), 2475754826  }
   0xf   : > { %835 = vmatprep.subr.mxu1 (!%p140_p9), %v995_v1  ;;  %837 = vmatprep.mubr.msk.f32.mxu1 (!%p140_p9), %vm996_vm0, %v995_v1  ;;  %v999_v34 = vmov (!%p140_p9), 2131351028   ;;  %v1000_v37 = vmov (!%p140_p9), 2102212464   ;;  %v1001_v40 = vmov (!%p140_p9), 920167782  }
  0x10   : > { %v250_v3 = vsub.f32 (!%p140_p9), %v167_v0, %v173_v2  ;;  %851 = vmatpush3.msra.mxu0 (!%p140_p9), %v173_v2  ;;  %836 = vmatpush3.msra.mxu1 (!%p140_p9), %v173_v2  ;;  %v1002_v43 = vmov (!%p140_p9), 1326507024   ;;  %s812_s5 = sshll.u32 (!%p140_p9), %s159_s4, 3  ;;  %s820_s8 = sshll.u32 (!%p140_p9), %s1045_s16, 7 }
  0x11   : > { %840 = vmatprep.subr.mxu1 (!%p140_p9), %v995_v1  ;;  %855 = vmatprep.subr.mxu0 (!%p140_p9), %v995_v1  ;;  %s161_s9 = scalar_lea.vmem (!%p140_p9), [#allocation2], %s812_s5  ;;  %s1117_s19 = scalar_lea.hbm (!%p140_p9), %s1162_s3, %s820_s8 }
  0x12   : > { %v251_v6 = vand.u32 (!%p140_p9), 4294901760, %v250_v3  ;;  %s749_s10 = sshll.u32 (!%p140_p9), %s161_s9, 4  ;;  %s736_s20 = scalar_lea.sflag (!%p140_p9), [#allocation3], %s159_s4  ;;  %s1119_s10 = int_to_ptr.vmem [resolvable:$true] %s749_s10 }
  0x13   : > { %s931_s24 = scalar_lea.vmem (!%p140_p9), %s1119_s10, 128 }
  0x14   : > { %v252_v9 = vsub.f32 (!%p140_p9), %v250_v3, %v251_v6  ;;  %p932_p11 = scmp.ne.s32.totalorder (!%p140_p9), %s1119_s10, %s931_s24 }
  0x15   : > { %s163_s26 = scalar_select %p162_p10, %s1045_s16, 1 }
  0x16   : > { %v253_v12 = vand.u32 4294901760, %v252_v9  ;;  %p933_p12 = pnand %p932_p11, %p1062_p5  ;;  %s1003_s16 = smov [#allocation2]  }
  0x17   : > { %s813_s27 = sshll.u32 %s163_s26, 3  ;;  %s935_s25 = sshll.u32 %s1003_s16, 4  ;;  %s936_s25 = int_to_ptr.vmem [resolvable:$false] %s935_s25 }
  0x18   : > { %s165_s30 = scalar_lea.vmem %s1159_s0, %s813_s27  ;;  %p934_p13 = pneg %p933_p12 }
  0x19   : > { %v166_v4 = vld [vmem:[%s165_s30] sm:$0xff]  ;;  %s937_s26 = scalar_lea.vmem %s936_s25, 256  ;;  %p938_p0 = scmp.lt.s32.totalorder %s1119_s10, %s936_s25 }
  0x1a   : > { %v170_v5 = vsel %vm168_vm1, %v166_v4, 0  ;;  %p939_p1 = scmp.lt.s32.totalorder %s937_s26, %s931_s24 }
  0x1b   : > { %v238_v7 = vand.u32 4294901760, %v170_v5 }
  0x1c   : > { %p940_p2 = por %p939_p1, %p938_p0 }
  0x1d   : > { %v239_v8 = vsub.f32 %v170_v5, %v238_v7 }
  0x1e   : > { %p941_p3 = pnand %p940_p2, %p934_p13 }
  0x1f   : > { %v240_v10 = vand.u32 4294901760, %v239_v8 }
  0x21   : > { %853 = vmatmul.mubr.f32.vlgmr.msra.gmra.mrb[0].mxu0 %v240_v10  ;;  %v241_v11 = vsub.f32 %v239_v8, %v240_v10 }
  0x22   : > { %856 = vmatpush3.msra.mxu0 %v251_v6  ;;  %857 = vmatprep.mubr.msk.f32.mxu0 %vm996_vm0, %v995_v1 }
  0x23   : > { %v242_v13 = vand.u32 4294901760, %v241_v11  ;;  %860 = vmatprep.subr.mxu0 %v995_v1 }
  0x25   : > { %838 = vmatmul.mubr.f32.vlgmr.msra.gmra.mrb[0].mxu1 %v242_v13 }
  0x26   : > { %841 = vmatpush3.msra.mxu1 %v253_v12  ;;  %842 = vmatprep.mubr.msk.f32.mxu1 %vm996_vm0, %v995_v1 }
  0x27   : > { %845 = vmatprep.subr.mxu1 %v995_v1 }
  0x29   : > { %858 = vmatmul.mubr.f32.vlgmr.msra.gmra.mrb[0].mxu0 %v238_v7 }
  0x2a   : > { %861 = vmatpush3.msra.mxu0 %v173_v2  ;;  %862 = vmatprep.mubr.msk.f32.mxu0 %vm996_vm0, %v995_v1 }
  0x2d   : > { %843 = vmatmul.mubr.f32.vlgmr.msra.gmra.mrb[0].mxu1 %v238_v7 }
  0x2e   : > { %846 = vmatpush3.msra.mxu1 %v250_v3  ;;  %847 = vmatprep.mubr.msk.f32.mxu1 %vm996_vm0, %v995_v1 }
  0x31   : > { %863 = vmatmul.mubr.f32.vlgmr.msra.gmra.mrb[0].mxu0 %v238_v7 }
  0x35   : > { %848 = vmatmul.mubr.f32.vlgmr.msra.gmra.mrb[0].mxu1 %v239_v8 }
 0x104   : > { %v614_v14 = vpop.f32.mrb[0].mxu0 }
 0x105   : > { %v864_v15 = vpop.f32.mrb[1].mxu0 }
 0x108   : > { %v394_v16 = vpop.f32.mrb[0].mxu1 }
 0x109   : > { %v1086_v17 = vadd.f32 %v614_v14, %v394_v16  ;;  %v849_v18 = vpop.f32.mrb[1].mxu1 }
 0x10b   : > { %v624_v19 = vand.u32 2139095040, %v1086_v17  ;;  %v621_v23 = vand.u32 2147483647, %v1086_v17  ;;  %vm623_vm9 = vcmp.lt.s32.totalorder %v1086_v17, 0  ;;  %vm618_vm11 = vcmp.eq.f32.partialorder %v1086_v17, 0.0 }
 0x10c   : > { %vm713_vm15 = vweird.f32 %v1086_v17 }
 0x10d   : > { %v625_v20 = vshrl.u32 %v624_v19, 23  ;;  %v628_v27 = vand.u32 8388607, %v621_v23  ;;  %vm622_vm10 = vcmp.le.f32.partialorder %v621_v23, 0.7853982 }
 0x10f   : > { %v814_v21 = vadd.s32 4294967169, %v625_v20  ;;  %v629_v45 = vor.u32 8388608, %v628_v27 }
 0x111   : > { %v631_v22 = vadd.s32 1, %v814_v21  ;;  %v669_v59 = vshll.u32 %v629_v45, 8  ;;  %v818_v45 = vld [vmem:[%s1161_s2] ss:$0 sm:$0xff] }
 0x113   : > { %vm632_vm2 = vcmp.gt.s32.totalorder %v631_v22, 0 }
 0x114   : > { %v633_v24 = vsel %vm632_vm2, %v631_v22, 0 }
 0x115   : > { %v635_v25 = vand.u32 31, %v633_v24  ;;  %v634_v28 = vshrl.u32 %v633_v24, 5 }
 0x117   : > { %v636_v26 = vsub.s32 32, %v635_v25  ;;  %v638_v30 = vshll.u32 %v997_v29, %v635_v25  ;;  %v641_v32 = vshll.u32 %v998_v31, %v635_v25  ;;  %v644_v36 = vshll.u32 %v999_v34, %v635_v25 }
 0x118   : > { %v647_v39 = vshll.u32 %v1000_v37, %v635_v25  ;;  %v650_v42 = vshll.u32 %v1001_v40, %v635_v25  ;;  %vm653_vm3 = vcmp.lt.s32.totalorder %v634_v28, 1  ;;  %vm656_vm4 = vcmp.lt.s32.totalorder %v634_v28, 4 }
 0x119   : > { %v639_v33 = vshrl.u32 %v998_v31, %v636_v26  ;;  %v642_v35 = vshrl.u32 %v999_v34, %v636_v26  ;;  %v645_v38 = vshrl.u32 %v1000_v37, %v636_v26  ;;  %v648_v41 = vshrl.u32 %v1001_v40, %v636_v26 }
 0x11a   : > { %v651_v44 = vshrl.u32 %v1002_v43, %v636_v26  ;;  %v637_v54 = vshrl.u32 %v997_v29, %v636_v26  ;;  %vm655_vm5 = vcmp.lt.s32.totalorder %v634_v28, 3  ;;  %vm654_vm6 = vcmp.lt.s32.totalorder %v634_v28, 2 }
 0x11b   : > { %v640_v46 = vor.u32 %v639_v33, %v638_v30  ;;  %v643_v47 = vor.u32 %v642_v35, %v641_v32  ;;  %v646_v48 = vor.u32 %v645_v38, %v644_v36  ;;  %v649_v49 = vor.u32 %v648_v41, %v647_v39 }
 0x11c   : > { %v652_v50 = vor.u32 %v651_v44, %v650_v42  ;;  %v619_v39 = vsel %vm618_vm11, 1.0, %v1086_v17 }
 0x11d   : > { %v658_v51 = vsel %vm656_vm4, %v646_v48, 2102212464  ;;  %v661_v52 = vsel %vm653_vm3, %v640_v46, %v643_v47  ;;  %v665_v53 = vsel %vm653_vm3, %v643_v47, %v646_v48  ;;  %v662_v55 = vsel %vm656_vm4, %v649_v49, 920167782 }
 0x11e   : > { %v666_v56 = vsel %vm656_vm4, %v652_v50, 1326507024  ;;  %v663_v57 = vsel %vm655_vm5, %v646_v48, %v662_v55  ;;  %v657_v60 = vsel %vm653_vm3, %v637_v54, %v640_v46  ;;  %v659_v61 = vsel %vm655_vm5, %v643_v47, %v658_v51 }
 0x11f   : > { %v667_v58 = vsel %vm655_vm5, %v649_v49, %v666_v56  ;;  %v664_v62 = vsel %vm654_vm6, %v661_v52, %v663_v57  ;;  %v660_v4 = vsel %vm654_vm6, %v657_v60, %v659_v61 }
 0x120   : > { %v668_v63 = vsel %vm654_vm6, %v665_v53, %v667_v58  ;;  %v1095_v2 = vmul.u32.u64.low %v669_v59, %v664_v62  ;;  %v1096_v3 = vmul.u32.u64.high %v669_v59, %v664_v62, %v1095_v2  ;;  %v676_v6 = vmul.u32 %v669_v59, %v660_v4 }
 0x121   : > { %v1092_v0 = vmul.u32.u64.low %v669_v59, %v668_v63  ;;  %v1093_v1 = vmul.u32.u64.high %v669_v59, %v668_v63, %v1092_v0 }
 0x122   : > { %v679_v5 = vadd.s32 1, %v1096_v3 }
 0x123   : > { %vm678_vm7 = vc.u32 %v1093_v1, %v1095_v2  ;;  %v677_v19 = vadd.s32 %v1095_v2, %v1093_v1 }
 0x124   : > { %v680_v7 = vsel %vm678_vm7, %v679_v5, %v1096_v3 }
 0x125   : > { %v681_v8 = vadd.s32 %v680_v7, %v676_v6 }
 0x127   : > { %v682_v9 = vadd.s32 536870912, %v681_v8 }
 0x129   : > { %v683_v10 = vshrl.u32 %v682_v9, 30 }
 0x12b   : > { %v684_v11 = vshll.u32 %v683_v10, 30  ;;  %v707_v32 = vsub.s32 4, %v683_v10 }
 0x12d   : > { %v685_v12 = vsub.s32 %v681_v8, %v684_v11  ;;  %v708_v35 = vsel %vm623_vm9, %v707_v32, %v683_v10 }
 0x12e   : > { %v710_v37 = vsel %vm622_vm10, 0, %v708_v35 }
 0x12f   : > { %v687_v13 = vsub.s32 0, %v685_v12  ;;  %v714_v38 = vadd.s32 3, %v710_v37 }
 0x131   : > { %v815_v14 = vmin.u32 %v687_v13, %v685_v12  ;;  %v715_v40 = vand.u32 3, %v714_v38 }
 0x133   : > { %v689_v15 = vclz %v815_v14  ;;  %vm720_vm12 = vcmp.eq.s32.totalorder %v715_v40, 2  ;;  %vm717_vm13 = vcmp.eq.s32.totalorder %v715_v40, 0  ;;  %vm716_vm14 = vcmp.lt.s32.totalorder %v715_v40, 2 }
 0x135   : > { %v816_v16 = vadd.s32 4294967294, %v689_v15 }
 0x137   : > { %vm817_vm8 = vcmp.lt.s32.totalorder %v816_v16, 0 }
 0x138   : > { %v692_v18 = vsel %vm817_vm8, 0, %v816_v16 }
 0x139   : > { %v693_v20 = vsub.s32 32, %v692_v18  ;;  %v697_v21 = vsub.s32 4294967266, %v692_v18  ;;  %v694_v22 = vshll.u32 %v685_v12, %v692_v18 }
 0x13b   : > { %v695_v24 = vshrl.u32 %v677_v19, %v693_v20  ;;  %v698_v25 = vadd.s32 127, %v697_v21 }
 0x13d   : > { %v696_v26 = vor.u32 %v695_v24, %v694_v22  ;;  %v699_v27 = vshll.u32 %v698_v25, 23 }
 0x13f   : > { %v700_v28 = vor.u32 4788187, %v699_v27  ;;  %v703_v30 = vcvt.s32.f32 %v696_v26 }
 0x141   : > { %v701_v29 = vand.u32 2147483647, %v700_v28 }
 0x143   : > { %v704_v31 = vmul.f32 %v703_v30, %v701_v29 }
 0x145   : > { %v705_v33 = vxor.u32 2147483648, %v704_v31 }
 0x147   : > { %v706_v34 = vsel %vm623_vm9, %v705_v33, %v704_v31 }
 0x148   : > { %v709_v36 = vsel %vm622_vm10, %v1086_v17, %v706_v34 }
 0x149   : > { %925 = vcosq.f32 %v709_v36 }
 0x14a   : > { %927 = vsinq.f32 %v709_v36 }
 0x14b   : > { %929 = vrcp.f32 %v619_v39 }
 0x153   : > { %v926_v41 = vpop.eup %925 }
 0x154   : > { %v928_v42 = vpop.eup %927  ;;  %v721_v23 = vxor.u32 2147483648, %v926_v41 }
 0x155   : > { %v718_v43 = vxor.u32 2147483648, %v928_v42  ;;  %v930_v50 = vpop.eup %929 }
 0x156   : > { %v722_v44 = vsel %vm720_vm12, %v721_v23, %v928_v42 }
 0x157   : > { %v719_v46 = vsel %vm717_vm13, %v926_v41, %v718_v43 }
 0x158   : > { %v723_v47 = vsel %vm716_vm14, %v719_v46, %v722_v44 }
 0x159   : > { %v724_v48 = vsel %vm713_vm15, nan, %v723_v47 }
 0x15a   : > { %v731_v49 = vmul.f32 %v818_v45, %v724_v48 }
 0x15c   : > { %v733_v51 = vmul.f32 %v930_v50, %v731_v49 }
 0x15e   : > { %734 = vst [vmem:[%s161_s9] sm:$0xff] %v733_v51 }
 0x15f   : > { %944 = shalt.err (!%p941_p3)
}
 0x160   : > { %s945_s27 = scalar_lea.hbm %s1117_s19, 128  ;;  %s949_s30 = scalar_lea.hbm %s1162_s3, 256 }
 0x161   : > { %p946_p4 = scmp.ne.s32.totalorder %s1117_s19, %s945_s27  ;;  %p950_p9 = scmp.lt.u32.totalorder %s1117_s19, %s1162_s3 }
 0x162   : > { %p951_p10 = scmp.lt.u32.totalorder %s949_s30, %s945_s27  ;;  %p953_p12 = scmp.lt.u32.totalorder %s945_s27, %s1117_s19 }
 0x163   : > { %p947_p7 = pnand %p946_p4, %p1062_p5 }
 0x164   : > { %p952_p11 = por %p951_p10, %p950_p9 }
 0x165   : > { %p948_p8 = pneg %p947_p7 }
 0x166   : > { %p954_p13 = por %p953_p12, %p952_p11 }
 0x168   : > { %p955_p0 = pnand %p954_p13, %p948_p8 }
 0x16a   : > { %958 = shalt.err (!%p955_p0)
}
 0x16b   : > { %878 = dma.vmem_to_hbm [thread:$0]  (%p1062_p5), %s1119_s10, 128, %s1117_s19, %s736_s20  }
 0x16c PF: > { %p884_p1 = scmp.ge.s32.totalorder %s993_s15, 2  ;;  %s761_s6 = sand.u32 1, %s981_s12  }
 0x16d   : > { %s762_s7 = scalar_lea.sflag [#allocation3], %s761_s6 }
 0x16e   : > { %p881_p2 = pnand %p884_p1, %p1066_p6 }
 0x170   : > { %976 = dma.done.wait (!%p881_p2), %s762_s7, 128  }
 0x171   : > { %978 = vsyncadd (!%p881_p2), %s762_s7, 4294967168  ;;  %p13_p3 = scmp.ge.s32.totalorder %s1049_s18, 4   ;;  %s1165_s12 = smov %s985_s13 }
 0x172   : > { %s1166_s13 = smov %s989_s14  ;;  %s1167_s14 = smov %s1060_s21 }
 0x173   : > { %s1168_s15 = smov %s1049_s18  ;;  %15 = sbr.rel (!%p13_p3) target bundleno = 3 (0x3), region = 67 }
 0x17a   :  { %767 = vsyncpa [#allocation3], 1 }
 0x17b   :  { %769 = vsyncpa [#allocation3 + $0x1], 1 }

</bundles_post_ra>
